<compile_context>
chip_gen: v7x
topology: tpu7x:2x2x1
jax: 0.10.0
libtpu: 0.0.40
codegen_flags: <defaults>
</compile_context>

<pallas_src>
import functools

import jax
import jax.numpy as jnp
from jax.experimental import pallas as pl
from jax.experimental.pallas import tpu as pltpu

LANE = 128        # TPU lane width (last-dim granularity)
B_TILE_MAX = 512  # max batch rows per grid step (weights are resident, VMEM is tiny)


def _round_up(n, m):
    return (n + m - 1) // m * m


def _pad2d(a, rows, cols):
    r, c = a.shape
    return jnp.pad(a, ((0, rows - r), (0, cols - c)))


def dqn_kernel(x_ref, w1_ref, b1_ref, w2_ref, b2_ref, w3_ref, b3_ref, o_ref):
    # Fused hot path for one batch tile: 3 MXU matmuls (bf16 operands, f32 accumulate)
    # + f32 bias adds and ReLUs on the VPU.  Weights stay VMEM-resident across tiles.
    x = x_ref[...].astype(jnp.bfloat16)                       # cast in-kernel, no HBM pass
    h1 = jnp.dot(x, w1_ref[...], preferred_element_type=jnp.float32)
    h1 = jnp.maximum(h1 + b1_ref[...], 0.0)
    h2 = jnp.dot(h1.astype(jnp.bfloat16), w2_ref[...], preferred_element_type=jnp.float32)
    h2 = jnp.maximum(h2 + b2_ref[...], 0.0)
    out = jnp.dot(h2.astype(jnp.bfloat16), w3_ref[...], preferred_element_type=jnp.float32)
    o_ref[...] = (out + b3_ref[...]).astype(o_ref.dtype)      # lane-dense (b_tile, OUTp) store


def prepare_params(params):
    """One-time prep (outside the hot path): pad hidden/output dims to lane multiples
    and cast weights to bf16.  K (input features) is intentionally NOT padded so the
    activations need no HBM-side padding either."""
    w1, b1, w2, b2, w3, b3 = (params[k] for k in ("w1", "b1", "w2", "b2", "w3", "b3"))
    K, H = w1.shape
    OUT = w3.shape[1]
    Hp = _round_up(H, LANE)
    OUTp = _round_up(OUT, LANE)
    prepared = {
        "w1": _pad2d(w1, K, Hp).astype(jnp.bfloat16),
        "b1": _pad2d(b1, 1, Hp),                        # biases stay f32 (VPU path)
        "w2": _pad2d(w2, Hp, Hp).astype(jnp.bfloat16),
        "b2": _pad2d(b2, 1, Hp),
        "w3": _pad2d(w3, Hp, OUTp).astype(jnp.bfloat16),
        "b3": _pad2d(b3, 1, OUTp),
    }
    return prepared, OUT


@functools.partial(jax.jit, static_argnames=("out_features",))
def dqn_forward(x, prepared, *, out_features):
    """x: (B, input_size) float32. prepared: dict from prepare_params (padded bf16 weights)."""
    w1, b1, w2, b2, w3, b3 = (prepared[k] for k in ("w1", "b1", "w2", "b2", "w3", "b3"))
    B, K = x.shape
    Hp = w1.shape[1]
    OUTp = w3.shape[1]

    if B <= B_TILE_MAX:
        # Single block = whole batch: no grid/pipeline overhead, no revisit bookkeeping.
        b_tile, n_tiles = B, 1
        semantics = ("arbitrary",)
    else:
        # Large batches: 512-row tiles; ragged last block rows are masked on store.
        b_tile, n_tiles = B_TILE_MAX, pl.cdiv(B, B_TILE_MAX)
        semantics = ("parallel",)      # split real work across TCs (v7x)

    resident = lambda shape: pl.BlockSpec(shape, lambda i: (0, 0))  # stays in VMEM

    flops = 2 * B * (K * Hp + Hp * Hp + Hp * OUTp)
    bytes_accessed = (
        x.size * 4
        + (w1.size + w2.size + w3.size) * 2
        + (b1.size + b2.size + b3.size) * 4
        + B * OUTp * 4
    )

    out_padded = pl.pallas_call(
        dqn_kernel,
        out_shape=jax.ShapeDtypeStruct((B, OUTp), jnp.float32),
        grid=(n_tiles,),
        in_specs=[
            pl.BlockSpec((b_tile, K), lambda i: (i, 0)),    # batch-tiled activations, K unpadded
            resident((K, Hp)), resident((1, Hp)),           # fc1
            resident((Hp, Hp)), resident((1, Hp)),          # fc2
            resident((Hp, OUTp)), resident((1, OUTp)),      # fc3
        ],
        out_specs=pl.BlockSpec((b_tile, OUTp), lambda i: (i, 0)),
        compiler_params=pltpu.CompilerParams(dimension_semantics=semantics),
        cost_estimate=pl.CostEstimate(
            flops=flops, transcendentals=0, bytes_accessed=bytes_accessed),
    )(x, w1, b1, w2, b2, w3, b3)

    return out_padded[:, :out_features]


def init_params(key, input_size, output_size, hidden_size):
    """Deterministic init mimicking nn.Linear's U(-1/sqrt(fan_in), 1/sqrt(fan_in))."""
    ks = jax.random.split(key, 6)

    def linear(kw, kb, fan_in, fan_out):
        bound = 1.0 / jnp.sqrt(fan_in)
        w = jax.random.uniform(kw, (fan_in, fan_out), jnp.float32, -bound, bound)
        b = jax.random.uniform(kb, (1, fan_out), jnp.float32, -bound, bound)
        return w, b

    w1, b1 = linear(ks[0], ks[1], input_size, hidden_size)
    w2, b2 = linear(ks[2], ks[3], hidden_size, hidden_size)
    w3, b3 = linear(ks[4], ks[5], hidden_size, output_size)
    return {"w1": w1, "b1": b1, "w2": w2, "b2": b2, "w3": w3, "b3": b3}


def dqn_reference(x, p):
    """Pure-JAX reference with matching operand precision (bf16 dots, f32 accumulate)."""
    def bdot(a, w):
        return jnp.dot(a.astype(jnp.bfloat16), w.astype(jnp.bfloat16),
                       preferred_element_type=jnp.float32)
    h1 = jnp.maximum(bdot(x, p["w1"]) + p["b1"], 0.0)
    h2 = jnp.maximum(bdot(h1, p["w2"]) + p["b2"], 0.0)
    return bdot(h2, p["w3"]) + p["b3"]


if __name__ == "__main__":
    # Shapes consistent with the module: state vector in, Q-values out; hidden=256 is
    # the module default.  batch=200 exercises the collapsed single-block path.
    batch = 200
    input_size = 32
    hidden_size = 256
    output_size = 8

    key = jax.random.PRNGKey(0)
    k_x, k_p, k_x2 = jax.random.split(key, 3)
    x = jax.random.normal(k_x, (batch, input_size), jnp.float32)
    params = init_params(k_p, input_size, output_size, hidden_size)

    prepared, out_features = prepare_params(params)           # one-time, outside hot path

    out = dqn_forward(x, prepared, out_features=out_features)
    out = jax.block_until_ready(out)
    ref = dqn_reference(x, params)
    assert out.shape == (batch, output_size)
    assert jnp.allclose(out, ref, atol=1e-3, rtol=1e-3), "mismatch vs. JAX reference (small batch)"

    # Also exercise the batch-tiled path (3 tiles of 512, ragged last block).
    big_batch = 1100
    x_big = jax.random.normal(k_x2, (big_batch, input_size), jnp.float32)
    out_big = jax.block_until_ready(dqn_forward(x_big, prepared, out_features=out_features))
    ref_big = dqn_reference(x_big, params)
    assert out_big.shape == (big_batch, output_size)
    assert jnp.allclose(out_big, ref_big, atol=1e-3, rtol=1e-3), "mismatch vs. JAX reference (tiled)"

    print("KERNEL_OK")
</pallas_src>

<mosaic_0001>
module attributes {stable_mosaic.version = 11 : i64} {
  func.func @dqn_kernel(%arg0: i32, %arg1: memref<200x32xf32, #tpu.memory_space<vmem>>, %arg2: memref<32x256xbf16, #tpu.memory_space<vmem>>, %arg3: memref<1x256xf32, #tpu.memory_space<vmem>>, %arg4: memref<256x256xbf16, #tpu.memory_space<vmem>>, %arg5: memref<1x256xf32, #tpu.memory_space<vmem>>, %arg6: memref<256x128xbf16, #tpu.memory_space<vmem>>, %arg7: memref<1x128xf32, #tpu.memory_space<vmem>>, %arg8: memref<200x128xf32, #tpu.memory_space<vmem>>) attributes {dimension_semantics = [#tpu.dimension_semantics<arbitrary>], iteration_bounds = array<i64: 1>, scalar_prefetch = 0 : i64, scratch_operands = 0 : i64, tpu.core_type = #tpu.core_type<tc>, window_params = [{transform_indices = @transform_0, window_bounds = array<i64: 200, 32>}, {pipeline_mode = #tpu.pipeline_mode<synchronous>, transform_indices = @transform_1, window_bounds = array<i64: 32, 256>}, {pipeline_mode = #tpu.pipeline_mode<synchronous>, transform_indices = @transform_2, window_bounds = array<i64: 1, 256>}, {pipeline_mode = #tpu.pipeline_mode<synchronous>, transform_indices = @transform_3, window_bounds = array<i64: 256, 256>}, {pipeline_mode = #tpu.pipeline_mode<synchronous>, transform_indices = @transform_4, window_bounds = array<i64: 1, 256>}, {pipeline_mode = #tpu.pipeline_mode<synchronous>, transform_indices = @transform_5, window_bounds = array<i64: 256, 128>}, {pipeline_mode = #tpu.pipeline_mode<synchronous>, transform_indices = @transform_6, window_bounds = array<i64: 1, 128>}, {transform_indices = @transform_7, window_bounds = array<i64: 200, 128>}]} {
    %c0 = arith.constant 0 : index
    %c0_0 = arith.constant 0 : index
    %0 = vector.load %arg1[%c0, %c0_0] : memref<200x32xf32, #tpu.memory_space<vmem>>, vector<200x32xf32>
    %1 = arith.truncf %0 : vector<200x32xf32> to vector<200x32xbf16>
    %c0_1 = arith.constant 0 : index
    %c0_2 = arith.constant 0 : index
    %2 = vector.load %arg2[%c0_1, %c0_2] : memref<32x256xbf16, #tpu.memory_space<vmem>>, vector<32x256xbf16>
    %cst = arith.constant dense<0.000000e+00> : vector<200x256xf32>
    %3 = tpu.matmul %1, %2, %cst {dimension_numbers = #tpu.dot_dimension_numbers<[1], [0], [0], [1], [0, 0, 1, 1], [], []>} : vector<200x32xbf16>, vector<32x256xbf16>, vector<200x256xf32> -> vector<200x256xf32>
    %c0_3 = arith.constant 0 : index
    %c0_4 = arith.constant 0 : index
    %4 = vector.load %arg3[%c0_3, %c0_4] : memref<1x256xf32, #tpu.memory_space<vmem>>, vector<1x256xf32>
    %5 = vector.broadcast %4 : vector<1x256xf32> to vector<200x256xf32>
    %6 = arith.addf %3, %5 : vector<200x256xf32>
    %cst_5 = arith.constant 0.000000e+00 : f32
    %7 = vector.broadcast %cst_5 : f32 to vector<200x256xf32>
    %8 = arith.maximumf %6, %7 : vector<200x256xf32>
    %9 = arith.truncf %8 : vector<200x256xf32> to vector<200x256xbf16>
    %c0_6 = arith.constant 0 : index
    %c0_7 = arith.constant 0 : index
    %10 = vector.load %arg4[%c0_6, %c0_7] : memref<256x256xbf16, #tpu.memory_space<vmem>>, vector<256x256xbf16>
    %cst_8 = arith.constant dense<0.000000e+00> : vector<200x256xf32>
    %11 = tpu.matmul %9, %10, %cst_8 {dimension_numbers = #tpu.dot_dimension_numbers<[1], [0], [0], [1], [0, 0, 1, 1], [], []>} : vector<200x256xbf16>, vector<256x256xbf16>, vector<200x256xf32> -> vector<200x256xf32>
    %c0_9 = arith.constant 0 : index
    %c0_10 = arith.constant 0 : index
    %12 = vector.load %arg5[%c0_9, %c0_10] : memref<1x256xf32, #tpu.memory_space<vmem>>, vector<1x256xf32>
    %13 = vector.broadcast %12 : vector<1x256xf32> to vector<200x256xf32>
    %14 = arith.addf %11, %13 : vector<200x256xf32>
    %cst_11 = arith.constant 0.000000e+00 : f32
    %15 = vector.broadcast %cst_11 : f32 to vector<200x256xf32>
    %16 = arith.maximumf %14, %15 : vector<200x256xf32>
    %17 = arith.truncf %16 : vector<200x256xf32> to vector<200x256xbf16>
    %c0_12 = arith.constant 0 : index
    %c0_13 = arith.constant 0 : index
    %18 = vector.load %arg6[%c0_12, %c0_13] : memref<256x128xbf16, #tpu.memory_space<vmem>>, vector<256x128xbf16>
    %cst_14 = arith.constant dense<0.000000e+00> : vector<200x128xf32>
    %19 = tpu.matmul %17, %18, %cst_14 {dimension_numbers = #tpu.dot_dimension_numbers<[1], [0], [0], [1], [0, 0, 1, 1], [], []>} : vector<200x256xbf16>, vector<256x128xbf16>, vector<200x128xf32> -> vector<200x128xf32>
    %c0_15 = arith.constant 0 : index
    %c0_16 = arith.constant 0 : index
    %20 = vector.load %arg7[%c0_15, %c0_16] : memref<1x128xf32, #tpu.memory_space<vmem>>, vector<1x128xf32>
    %21 = vector.broadcast %20 : vector<1x128xf32> to vector<200x128xf32>
    %22 = arith.addf %19, %21 : vector<200x128xf32>
    %c0_17 = arith.constant 0 : index
    %c0_18 = arith.constant 0 : index
    %23 = vector.load %arg8[%c0_17, %c0_18] : memref<200x128xf32, #tpu.memory_space<vmem>>, vector<200x128xf32>
    tpu.vector_store %arg8[%c0_17, %c0_18], %22 {strides = array<i32>} : memref<200x128xf32, #tpu.memory_space<vmem>>, vector<200x128xf32>,
    return
  }
  func.func @transform_0(%arg0: i32) -> (i32, i32) {
    %c0_i32 = arith.constant 0 : i32
    %c0_i32_0 = arith.constant 0 : i32
    return %arg0, %c0_i32 : i32, i32
  }
  func.func @transform_1(%arg0: i32) -> (i32, i32) {
    %c0_i32 = arith.constant 0 : i32
    %c0_i32_0 = arith.constant 0 : i32
    %c0_i32_1 = arith.constant 0 : i32
    return %c0_i32, %c0_i32_0 : i32, i32
  }
  func.func @transform_2(%arg0: i32) -> (i32, i32) {
    %c0_i32 = arith.constant 0 : i32
    %c0_i32_0 = arith.constant 0 : i32
    %c0_i32_1 = arith.constant 0 : i32
    return %c0_i32, %c0_i32_0 : i32, i32
  }
  func.func @transform_3(%arg0: i32) -> (i32, i32) {
    %c0_i32 = arith.constant 0 : i32
    %c0_i32_0 = arith.constant 0 : i32
    %c0_i32_1 = arith.constant 0 : i32
    return %c0_i32, %c0_i32_0 : i32, i32
  }
  func.func @transform_4(%arg0: i32) -> (i32, i32) {
    %c0_i32 = arith.constant 0 : i32
    %c0_i32_0 = arith.constant 0 : i32
    %c0_i32_1 = arith.constant 0 : i32
    return %c0_i32, %c0_i32_0 : i32, i32
  }
  func.func @transform_5(%arg0: i32) -> (i32, i32) {
    %c0_i32 = arith.constant 0 : i32
    %c0_i32_0 = arith.constant 0 : i32
    %c0_i32_1 = arith.constant 0 : i32
    return %c0_i32, %c0_i32_0 : i32, i32
  }
  func.func @transform_6(%arg0: i32) -> (i32, i32) {
    %c0_i32 = arith.constant 0 : i32
    %c0_i32_0 = arith.constant 0 : i32
    %c0_i32_1 = arith.constant 0 : i32
    return %c0_i32, %c0_i32_0 : i32, i32
  }
  func.func @transform_7(%arg0: i32) -> (i32, i32) {
    %c0_i32 = arith.constant 0 : i32
    %c0_i32_0 = arith.constant 0 : i32
    return %arg0, %c0_i32 : i32, i32
  }
}

</mosaic_0001>

<bundles_post_ra>
// kernel: dqn_forward.1
= control target key start
LH: loop header
LB: loop body
LE: loop exit
PB: predicated region body
PF: predicated region fallthrough
CT: control target
= control target key end

     0   :  { %12 = vsyncpa [#allocation3], 0  ;;  %s1961_s0 = inlined_call_operand.vmem [shape: f32[200,32], index: 0, kind: input, shape index: {}]   ;;  %s1962_s1 = inlined_call_operand.hbm [shape: bf16[32,256], index: 1, kind: input, shape index: {}]   ;;  %s1963_s2 = inlined_call_operand.vmem [shape: f32[1,256], index: 2, kind: input, shape index: {}]   ;;  %s1964_s3 = inlined_call_operand.vmem [shape: bf16[256,256], index: 3, kind: input, shape index: {}]   ;;  %s1965_s4 = inlined_call_operand.vmem [shape: f32[1,256], index: 4, kind: input, shape index: {}]   ;;  %s1966_s5 = inlined_call_operand.hbm [shape: bf16[256,128], index: 5, kind: input, shape index: {}]   ;;  %s1967_s6 = inlined_call_operand.vmem [shape: f32[1,128], index: 6, kind: input, shape index: {}]   ;;  %s1968_s7 = inlined_call_operand.vmem [shape: f32[200,128], index: 7, kind: output, shape index: {}]  }
   0x1   :  { %13 = vsyncpa [#allocation5], 0  ;;  %s1438_s24 = smov [#allocation2]   ;;  %s1390_s28 = scalar_lea.hbm %s1962_s1, 512 }
   0x2   :  { %s21_s25 = sshll.u32 %s1438_s24, 4  ;;  %p1391_p0 = scmp.ne.s32.totalorder %s1962_s1, %s1390_s28  ;;  %s22_s25 = int_to_ptr.vmem [resolvable:$true] %s21_s25 }
   0x3   :  { %p1394_p1 = scmp.lt.u32.totalorder %s1390_s28, %s1962_s1 }
   0x5   :  { %p1396_p2 = pnand %p1394_p1, %p1391_p0 }
   0x7   :  { %1399 = shalt.err (!%p1396_p2)
}
   0x8   :  { %s1400_s10 = scalar_lea.vmem %s22_s25, 512  ;;  %p1405_p4 = scmp.lt.s32.totalorder %s22_s25, %s22_s25 }
   0x9   :  { %p1401_p3 = scmp.ne.s32.totalorder %s22_s25, %s1400_s10  ;;  %p1406_p5 = scmp.lt.s32.totalorder %s1400_s10, %s1400_s10 }
   0xb   :  { %p1407_p6 = por %p1406_p5, %p1405_p4 }
   0xd   :  { %p1408_p7 = pnand %p1407_p6, %p1401_p3 }
   0xf   :  { %1411 = shalt.err (!%p1408_p7)
}
  0x10   :  { %s1439_s11 = smov 128   ;;  %s1440_s12 = smov 8  }
  0x11   :  { %27 = dma.hbm_to_vmem [thread:$0]  %s1962_s1, 512, %s22_s25, [#allocation3], %s1439_s11, %s1439_s11, %s1440_s12  }
  0x12   :  { %s1441_s15 = smov [#allocation4]   ;;  %s1412_s19 = scalar_lea.hbm %s1966_s5, 2048 }
  0x13   :  { %s39_s16 = sshll.u32 %s1441_s15, 4  ;;  %p1413_p8 = scmp.ne.s32.totalorder %s1966_s5, %s1412_s19  ;;  %s40_s16 = int_to_ptr.vmem [resolvable:$true] %s39_s16 }
  0x14   :  { %p1416_p9 = scmp.lt.u32.totalorder %s1412_s19, %s1966_s5 }
  0x16   :  { %p1418_p10 = pnand %p1416_p9, %p1413_p8 }
  0x18   :  { %1421 = shalt.err (!%p1418_p10)
}
  0x19   :  { %s1422_s24 = scalar_lea.vmem %s40_s16, 2048  ;;  %p1427_p12 = scmp.lt.s32.totalorder %s40_s16, %s40_s16 }
  0x1a   :  { %p1423_p11 = scmp.ne.s32.totalorder %s40_s16, %s1422_s24  ;;  %p1428_p13 = scmp.lt.s32.totalorder %s1422_s24, %s1422_s24 }
  0x1c   :  { %p1429_p0 = por %p1428_p13, %p1427_p12 }
  0x1e   :  { %p1430_p1 = pnand %p1429_p0, %p1423_p11 }
  0x20   :  { %1433 = shalt.err (!%p1430_p1)
}
  0x21   :  { %s1442_s1 = smov 64   ;;  %s1443_s25 = smov 4  }
  0x22   :  { %45 = dma.hbm_to_vmem [thread:$0]  %s1966_s5, 2048, %s40_s16, [#allocation5], %s1442_s1, %s1442_s1, %s1443_s25  }
  0x23   :  { %1434 = dma.done.wait [#allocation3], 512  }
  0x24   :  { %1435 = vsyncadd [#allocation3], 4294966784 }
  0x25   :  { %1436 = dma.done.wait [#allocation5], 2048  }
  0x26   :  { %1437 = vsyncadd [#allocation5], 4294965248  ;;  %v1444_v0 = vmov 0   ;;  %v1320_v1 = vld [vmem:[#allocation2 + $0x4] ss:$8 sps:$4 sm:$0xff]   ;;  %v65_v8 = vld [vmem:[%s1961_s0 + $0x50] sm:$0xff] }
  0x27   :  { %201 = vmatprep.mubr.bf16.mxu0 %v1444_v0  ;;  %251 = vmatprep.mubr.bf16.mxu1 %v1444_v0  ;;  %v1322_v2 = vld [vmem:[#allocation2] ss:$8 sps:$4 sm:$0xff]   ;;  %v1323_v3 = vld [vmem:[#allocation2 + $0x14] ss:$8 sps:$4 sm:$0xff]   ;;  %v1325_v4 = vld [vmem:[#allocation2 + $0x10] ss:$8 sps:$4 sm:$0xff]  }
  0x28   :  { %169 = vmatprep.subr.bf16.mxu0 %v1320_v1  ;;  %1309 = vmatprep.subr.bf16.mxu1 %v1320_v1  ;;  %v55_v5 = vld [vmem:[%s1961_s0] sm:$0xff]  ;;  %v56_v6 = vld [vmem:[%s1961_s0 + $0x8] sm:$0xff]  ;;  %v66_v9 = vld [vmem:[%s1961_s0 + $0x58] sm:$0xff]  ;;  %vm129_vm0 = vcmask 261120  }
  0x29   :  { %170 = vmatpush1.bf16.msra.mxu0 %v1322_v2  ;;  %1311 = vmatpush1.bf16.msra.mxu1 %v1322_v2  ;;  %v80_v7 = vpack.c.bf16 %v56_v6, %v55_v5  ;;  %v85_v10 = vpack.c.bf16 %v66_v9, %v65_v8  ;;  %v57_v11 = vld [vmem:[%s1961_s0 + $0x10] sm:$0xff]  ;;  %v58_v12 = vld [vmem:[%s1961_s0 + $0x18] sm:$0xff]  ;;  %v67_v13 = vld [vmem:[%s1961_s0 + $0x60] sm:$0xff] }
  0x2a   :  { %171 = vmatprep.subr.bf16.mxu0 %v1323_v3  ;;  %1310 = vmatprep.subr.bf16.mxu1 %v1323_v3  ;;  %v68_v14 = vld [vmem:[%s1961_s0 + $0x68] sm:$0xff]  ;;  %v1331_v17 = vld [vmem:[%s1964_s3 + $0x14] ss:$8 sps:$4 sm:$0xff]   ;;  %v81_v18 = vpack.c.bf16 %v58_v12, %v57_v11  ;;  %v1329_v20 = vld [vmem:[%s1964_s3 + $0x10] ss:$8 sps:$4 sm:$0xff]  }
  0x2b   :  { %v1326_v15 = vld [vmem:[%s1964_s3] ss:$8 sps:$4 sm:$0xff]   ;;  %v1328_v16 = vld [vmem:[%s1964_s3 + $0x4] ss:$8 sps:$4 sm:$0xff]   ;;  %v86_v19 = vpack.c.bf16 %v68_v14, %v67_v13  ;;  %v69_v24 = vld [vmem:[%s1961_s0 + $0x70] sm:$0xff] }
  0x2c   :  { %v59_v21 = vld [vmem:[%s1961_s0 + $0x20] sm:$0xff]  ;;  %v60_v23 = vld [vmem:[%s1961_s0 + $0x28] sm:$0xff]  ;;  %v70_v25 = vld [vmem:[%s1961_s0 + $0x78] sm:$0xff] }
  0x2d   :  { %172 = vmatpush1.bf16.msra.mxu0 %v1325_v4  ;;  %1312 = vmatpush1.bf16.msra.mxu1 %v1325_v4  ;;  %v1334_v22 = vld [vmem:[%s1964_s3 + $0x24] ss:$8 sps:$4 sm:$0xff]   ;;  %v1332_v26 = vld [vmem:[%s1964_s3 + $0x20] ss:$8 sps:$4 sm:$0xff]   ;;  %v1337_v27 = vld [vmem:[%s1964_s3 + $0x34] ss:$8 sps:$4 sm:$0xff]   ;;  %v82_v28 = vpack.c.bf16 %v60_v23, %v59_v21  ;;  %v87_v29 = vpack.c.bf16 %v70_v25, %v69_v24 }
  0x2e   :  { %610 = vmatprep.subr.bf16.mxu1 %v1328_v16  ;;  %v1335_v30 = vld [vmem:[%s1964_s3 + $0x30] ss:$8 sps:$4 sm:$0xff]   ;;  %v1340_v32 = vld [vmem:[%s1964_s3 + $0x44] ss:$8 sps:$4 sm:$0xff]   ;;  %v1338_v36 = vld [vmem:[%s1964_s3 + $0x40] ss:$8 sps:$4 sm:$0xff]   ;;  %v99_v16 = vlaneseq }
  0x2f   :  { %v61_v31 = vld [vmem:[%s1961_s0 + $0x30] sm:$0xff]  ;;  %v62_v33 = vld [vmem:[%s1961_s0 + $0x38] sm:$0xff]  ;;  %v71_v34 = vld [vmem:[%s1961_s0 + $0x80] sm:$0xff] }
  0x30   :  { %1153 = vmatmul.mubr.msk.bf16.vlgmr.msra.gmra.mrb[0].mxu0 %vm129_vm0, %v80_v7  ;;  %1158 = vmatmul.mubr.msk.bf16.vlgmr.msra.gmra.mrb[0].mxu1 %vm129_vm0, %v85_v10  ;;  %v72_v35 = vld [vmem:[%s1961_s0 + $0x88] sm:$0xff]  ;;  %v1343_v37 = vld [vmem:[%s1964_s3 + $0x54] ss:$8 sps:$4 sm:$0xff]   ;;  %v83_v38 = vpack.c.bf16 %v62_v33, %v61_v31  ;;  %v1341_v40 = vld [vmem:[%s1964_s3 + $0x50] ss:$8 sps:$4 sm:$0xff]  }
  0x31   :  { %211 = vmatprep.mubr.bf16.mxu0 %v1444_v0  ;;  %261 = vmatprep.mubr.bf16.mxu1 %v1444_v0  ;;  %v88_v39 = vpack.c.bf16 %v72_v35, %v71_v34  ;;  %v1346_v41 = vld [vmem:[%s1964_s3 + $0x64] ss:$8 sps:$4 sm:$0xff]   ;;  %v73_v44 = vld [vmem:[%s1961_s0 + $0x90] sm:$0xff]  ;;  %v74_v45 = vld [vmem:[%s1961_s0 + $0x98] sm:$0xff] }
  0x32   :  { %611 = vmatpush1.bf16.msra.mxu1 %v1326_v15  ;;  %v63_v42 = vld [vmem:[%s1961_s0 + $0x40] sm:$0xff]  ;;  %v64_v43 = vld [vmem:[%s1961_s0 + $0x48] sm:$0xff]  ;;  %v1349_v47 = vld [vmem:[%s1964_s3 + $0x74] ss:$8 sps:$4 sm:$0xff]   ;;  %v89_v49 = vpack.c.bf16 %v74_v45, %v73_v44 }
  0x33   :  { %612 = vmatprep.subr.bf16.mxu1 %v1331_v17  ;;  %v1344_v46 = vld [vmem:[%s1964_s3 + $0x60] ss:$8 sps:$4 sm:$0xff]   ;;  %v84_v48 = vpack.c.bf16 %v64_v43, %v63_v42  ;;  %v1347_v50 = vld [vmem:[%s1964_s3 + $0x70] ss:$8 sps:$4 sm:$0xff]   ;;  %v1352_v51 = vld [vmem:[%s1964_s3 + $0x84] ss:$8 sps:$4 sm:$0xff]  }
  0x34   :  { %v75_v52 = vld [vmem:[%s1961_s0 + $0xa0] sm:$0xff]  ;;  %v76_v53 = vld [vmem:[%s1961_s0 + $0xa8] sm:$0xff]  ;;  %v1355_v55 = vld [vmem:[%s1964_s3 + $0x94] ss:$8 sps:$4 sm:$0xff]  }
  0x35   :  { %v1350_v54 = vld [vmem:[%s1964_s3 + $0x80] ss:$8 sps:$4 sm:$0xff]   ;;  %v90_v56 = vpack.c.bf16 %v76_v53, %v75_v52  ;;  %v1353_v57 = vld [vmem:[%s1964_s3 + $0x90] ss:$8 sps:$4 sm:$0xff]   ;;  %v1358_v58 = vld [vmem:[%s1964_s3 + $0xa4] ss:$8 sps:$4 sm:$0xff]  }
  0x36   :  { %613 = vmatpush1.bf16.msra.mxu1 %v1329_v20  ;;  %v77_v59 = vld [vmem:[%s1961_s0 + $0xb0] sm:$0xff]  ;;  %v78_v60 = vld [vmem:[%s1961_s0 + $0xb8] sm:$0xff]  ;;  %v1356_v61 = vld [vmem:[%s1964_s3 + $0xa0] ss:$8 sps:$4 sm:$0xff]  }
  0x37   :  { %614 = vmatprep.subr.bf16.mxu1 %v1334_v22  ;;  %v1361_v62 = vld [vmem:[%s1964_s3 + $0xb4] ss:$8 sps:$4 sm:$0xff]   ;;  %v91_v63 = vpack.c.bf16 %v78_v60, %v77_v59  ;;  %v1359_v1 = vld [vmem:[%s1964_s3 + $0xb0] ss:$8 sps:$4 sm:$0xff]   ;;  %v1364_v2 = vld [vmem:[%s1964_s3 + $0xc4] ss:$8 sps:$4 sm:$0xff]  }
  0x38   :  { %1154 = vmatmul.mubr.msk.bf16.gmra.mrb[4].mxu0 %vm129_vm0, %v81_v18  ;;  %1159 = vmatmul.mubr.msk.bf16.gmra.mrb[4].mxu1 %vm129_vm0, %v86_v19  ;;  %v79_v3 = vld [vmem:[%s1961_s0 + $0xc0] sm:$0xff]  ;;  %v1367_v5 = vld [vmem:[%s1964_s3 + $0xd4] ss:$8 sps:$4 sm:$0xff]   ;;  %v1371_v10 = vld [vmem:[%s1964_s3 + $0xf0] ss:$8 sps:$4 sm:$0xff]   ;;  %v1706_v19 = vshrl.u32 %v99_v16, 7 }
  0x39   :  { %221 = vmatprep.mubr.bf16.mxu0 %v1444_v0  ;;  %271 = vmatprep.mubr.bf16.mxu1 %v1444_v0  ;;  %v1362_v4 = vld [vmem:[%s1964_s3 + $0xc0] ss:$8 sps:$4 sm:$0xff]   ;;  %v92_v6 = vpack.c.bf16 %v79_v3, %v79_v3  ;;  %v1370_v7 = vld [vmem:[%s1964_s3 + $0xe4] ss:$8 sps:$4 sm:$0xff]   ;;  %v1373_v9 = vld [vmem:[%s1964_s3 + $0xf4] ss:$8 sps:$4 sm:$0xff]  }
  0x3a   :  { %615 = vmatpush1.bf16.msra.mxu1 %v1332_v26  ;;  %v1368_v8 = vld [vmem:[%s1964_s3 + $0xe0] ss:$8 sps:$4 sm:$0xff]   ;;  %v1378_v15 = vld [vmem:[#allocation4 + $0x50] sm:$0xff]   ;;  %v1380_v18 = vld [vmem:[#allocation4 + $0x58] sm:$0xff]   ;;  %v101_v22 = vsub.s32 0, %v1706_v19  ;;  %v105_v24 = vsub.s32 1, %v1706_v19 }
  0x3b   :  { %616 = vmatprep.subr.bf16.mxu1 %v1337_v27  ;;  %v1374_v11 = vld [vmem:[#allocation4 + $0x40] sm:$0xff]   ;;  %v1376_v13 = vld [vmem:[#allocation4 + $0x48] sm:$0xff]   ;;  %v1379_v17 = vld [vmem:[#allocation4 + $0x10] sm:$0xff]  }
  0x3c   :  { %v1375_v12 = vld [vmem:[#allocation4] sm:$0xff]   ;;  %1215 = vmatprep.subr.bf16.mxu0 %v1374_v11  ;;  %v1377_v14 = vld [vmem:[#allocation4 + $0x8] sm:$0xff]   ;;  %v1381_v20 = vld [vmem:[#allocation4 + $0x18] sm:$0xff]  }
  0x3d   :  { %1216 = vmatpush3.bf16.msra.mxu0 %v1375_v12  ;;  %v1382_v21 = vld [vmem:[#allocation4 + $0x60] sm:$0xff]   ;;  %v1384_v26 = vld [vmem:[#allocation4 + $0x68] sm:$0xff]  }
  0x3e   :  { %617 = vmatpush1.bf16.msra.mxu1 %v1335_v30  ;;  %1217 = vmatprep.subr.bf16.mxu0 %v1376_v13  ;;  %v97_v23 = vld [vmem:[%s1963_s2] sm:$0x3] }
  0x3f   :  { %618 = vmatprep.subr.bf16.mxu1 %v1340_v32  ;;  %v1383_v25 = vld [vmem:[#allocation4 + $0x20] sm:$0xff]   ;;  %v1715_v27 = vrot.slane %v97_v23, %v101_v22 }
  0x40   :  { %1155 = vmatmul.mubr.msk.bf16.gmra.mrb[8].mxu0 %vm129_vm0, %v82_v28  ;;  %1160 = vmatmul.mubr.msk.bf16.gmra.mrb[8].mxu1 %vm129_vm0, %v87_v29  ;;  %v1719_v28 = vrot.slane %v97_v23, %v105_v24  ;;  %v1385_v29 = vld [vmem:[#allocation4 + $0x28] sm:$0xff]  }
  0x41   :  { %231 = vmatprep.mubr.bf16.mxu0 %v1444_v0  ;;  %281 = vmatprep.mubr.bf16.mxu1 %v1444_v0 }
  0x42   :  { %619 = vmatpush1.bf16.msra.mxu1 %v1338_v36  ;;  %1218 = vmatpush3.bf16.msra.mxu0 %v1377_v14 }
  0x43   :  { %620 = vmatprep.subr.bf16.mxu1 %v1343_v37  ;;  %1219 = vmatprep.subr.bf16.mxu0 %v1378_v15 }
  0x46   :  { %621 = vmatpush1.bf16.msra.mxu1 %v1341_v40  ;;  %1220 = vmatpush3.bf16.msra.mxu0 %v1379_v17 }
  0x47   :  { %622 = vmatprep.subr.bf16.mxu1 %v1346_v41  ;;  %1221 = vmatprep.subr.bf16.mxu0 %v1380_v18 }
  0x48   :  { %1156 = vmatmul.mubr.msk.bf16.gmra.mrb[12].mxu0 %vm129_vm0, %v83_v38  ;;  %1161 = vmatmul.mubr.msk.bf16.gmra.mrb[12].mxu1 %vm129_vm0, %v88_v39 }
  0x49   :  { %241 = vmatprep.mubr.bf16.mxu0 %v1444_v0  ;;  %291 = vmatprep.mubr.bf16.mxu1 %v1444_v0 }
  0x4a   :  { %623 = vmatpush1.bf16.msra.mxu1 %v1344_v46  ;;  %1222 = vmatpush3.bf16.msra.mxu0 %v1381_v20 }
  0x4b   :  { %624 = vmatprep.subr.bf16.mxu1 %v1349_v47  ;;  %1223 = vmatprep.subr.bf16.mxu0 %v1382_v21 }
  0x4e   :  { %625 = vmatpush1.bf16.msra.mxu1 %v1347_v50  ;;  %1224 = vmatpush3.bf16.msra.mxu0 %v1383_v25 }
  0x4f   :  { %626 = vmatprep.subr.bf16.mxu1 %v1352_v51  ;;  %1225 = vmatprep.subr.bf16.mxu0 %v1384_v26 }
  0x50   :  { %1157 = vmatmul.mubr.msk.bf16.gmra.mrb[16].mxu0 %vm129_vm0, %v84_v48  ;;  %1162 = vmatmul.mubr.msk.bf16.gmra.mrb[16].mxu1 %vm129_vm0, %v89_v49 }
  0x51   :  { %301 = vmatprep.mubr.bf16.mxu1 %v1444_v0 }
  0x52   :  { %627 = vmatpush1.bf16.msra.mxu1 %v1350_v54  ;;  %1226 = vmatpush3.bf16.msra.mxu0 %v1385_v29 }
  0x53   :  { %628 = vmatprep.subr.bf16.mxu1 %v1355_v55 }
  0x56   :  { %629 = vmatpush1.bf16.msra.mxu1 %v1353_v57 }
  0x57   :  { %630 = vmatprep.subr.bf16.mxu1 %v1358_v58 }
  0x58   :  { %1163 = vmatmul.mubr.msk.bf16.gmra.mrb[20].mxu1 %vm129_vm0, %v90_v56 }
  0x59   :  { %311 = vmatprep.mubr.bf16.mxu1 %v1444_v0 }
  0x5a   :  { %631 = vmatpush1.bf16.msra.mxu1 %v1356_v61 }
  0x5b   :  { %632 = vmatprep.subr.bf16.mxu1 %v1361_v62 }
  0x5e   :  { %633 = vmatpush1.bf16.msra.mxu1 %v1359_v1 }
  0x5f   :  { %634 = vmatprep.subr.bf16.mxu1 %v1364_v2 }
  0x60   :  { %1164 = vmatmul.mubr.msk.bf16.gmra.mrb[24].mxu1 %vm129_vm0, %v91_v63 }
  0x61   :  { %321 = vmatprep.mubr.bf16.mxu1 %v1444_v0  ;;  %v1365_v0 = vld [vmem:[%s1964_s3 + $0xd0] ss:$8 sps:$4 sm:$0xff]  }
  0x62   :  { %635 = vmatpush1.bf16.msra.mxu1 %v1362_v4 }
  0x63   :  { %636 = vmatprep.subr.bf16.mxu1 %v1367_v5 }
  0x66   :  { %637 = vmatpush1.bf16.msra.mxu1 %v1365_v0 }
  0x67   :  { %638 = vmatprep.subr.bf16.mxu1 %v1370_v7 }
  0x68   :  { %1165 = vmatmul.mubr.msk.bf16.gmra.mrb[28].mxu1 %vm129_vm0, %v92_v6 }
  0x6a   :  { %639 = vmatpush1.bf16.msra.mxu1 %v1368_v8 }
  0x6b   :  { %640 = vmatprep.subr.bf16.mxu1 %v1373_v9 }
  0x6e   :  { %641 = vmatpush1.bf16.msra.mxu1 %v1371_v10 }
 0x103   :  { %v203_v30 = vpop.f32.mrb[0].mxu0  ;;  %v253_v31 = vpop.f32.mrb[0].mxu1 }
 0x104   :  { %v204_v32 = vadd.f32 %v203_v30, %v1715_v27  ;;  %v205_v33 = vpop.f32.mrb[1].mxu0  ;;  %v254_v34 = vadd.f32 %v253_v31, %v1715_v27  ;;  %v255_v35 = vpop.f32.mrb[1].mxu1 }
 0x105   :  { %v206_v36 = vadd.f32 %v205_v33, %v1719_v28  ;;  %v207_v37 = vpop.f32.mrb[2].mxu0  ;;  %v256_v38 = vadd.f32 %v255_v35, %v1719_v28  ;;  %v257_v39 = vpop.f32.mrb[2].mxu1 }
 0x106   :  { %v208_v40 = vadd.f32 %v207_v37, %v1715_v27  ;;  %v209_v41 = vpop.f32.mrb[3].mxu0  ;;  %v350_v42 = vmax.f32 %v254_v34, 0.0  ;;  %v258_v43 = vadd.f32 %v257_v39, %v1715_v27  ;;  %v259_v44 = vpop.f32.mrb[3].mxu1  ;;  %v330_v48 = vmax.f32 %v204_v32, 0.0 }
 0x107   :  { %v210_v45 = vadd.f32 %v209_v41, %v1719_v28  ;;  %v351_v46 = vmax.f32 %v256_v38, 0.0  ;;  %v260_v47 = vadd.f32 %v259_v44, %v1719_v28  ;;  %v331_v51 = vmax.f32 %v206_v36, 0.0 }
 0x108   :  { %v332_v49 = vmax.f32 %v208_v40, 0.0  ;;  %v352_v50 = vmax.f32 %v258_v43, 0.0 }
 0x109   :  { %v333_v52 = vmax.f32 %v210_v45, 0.0  ;;  %v353_v53 = vmax.f32 %v260_v47, 0.0 }
 0x10a   :  { %v380_v54 = vpack.c.bf16 %v332_v49, %v330_v48  ;;  %v1729_v55 = vpack.c.bf16 %v352_v50, %v350_v42 }
 0x10b   :  { %v381_v56 = vpack.c.bf16 %v333_v52, %v331_v51  ;;  %v213_v57 = vpop.f32.mrb[4].mxu0  ;;  %v1731_v58 = vpack.c.bf16 %v353_v53, %v351_v46  ;;  %v263_v59 = vpop.f32.mrb[4].mxu1 }
 0x10c   :  { %v214_v60 = vadd.f32 %v213_v57, %v1715_v27  ;;  %v215_v61 = vpop.f32.mrb[5].mxu0  ;;  %v264_v62 = vadd.f32 %v263_v59, %v1715_v27  ;;  %v265_v63 = vpop.f32.mrb[5].mxu1 }
 0x10d   :  { %v216_v1 = vadd.f32 %v215_v61, %v1719_v28  ;;  %v217_v2 = vpop.f32.mrb[6].mxu0  ;;  %642 = vmatprep.mubr.bf16.mxu1 %v381_v56  ;;  %v266_v3 = vadd.f32 %v265_v63, %v1719_v28  ;;  %v267_v4 = vpop.f32.mrb[6].mxu1 }
 0x10e   :  { %v218_v5 = vadd.f32 %v217_v2, %v1715_v27  ;;  %v219_v6 = vpop.f32.mrb[7].mxu0  ;;  %643 = vmatmul.mubr.bf16.vlgmr.msra.gmra.mrb[32].mxu1 %v380_v54  ;;  %v354_v0 = vmax.f32 %v264_v62, 0.0  ;;  %v268_v7 = vadd.f32 %v267_v4, %v1715_v27  ;;  %v269_v8 = vpop.f32.mrb[7].mxu1  ;;  %v334_v12 = vmax.f32 %v214_v60, 0.0 }
 0x10f   :  { %v220_v9 = vadd.f32 %v219_v6, %v1719_v28  ;;  %v355_v10 = vmax.f32 %v266_v3, 0.0  ;;  %v270_v11 = vadd.f32 %v269_v8, %v1719_v28  ;;  %v335_v15 = vmax.f32 %v216_v1, 0.0 }
 0x110   :  { %v336_v13 = vmax.f32 %v218_v5, 0.0  ;;  %v356_v14 = vmax.f32 %v268_v7, 0.0 }
 0x111   :  { %v337_v16 = vmax.f32 %v220_v9, 0.0  ;;  %v357_v17 = vmax.f32 %v270_v11, 0.0 }
 0x112   :  { %v382_v18 = vpack.c.bf16 %v336_v13, %v334_v12  ;;  %v1741_v20 = vpack.c.bf16 %v356_v14, %v354_v0 }
 0x113   :  { %v383_v21 = vpack.c.bf16 %v337_v16, %v335_v15  ;;  %v223_v23 = vpop.f32.mrb[8].mxu0  ;;  %v1743_v25 = vpack.c.bf16 %v357_v17, %v355_v10  ;;  %v273_v26 = vpop.f32.mrb[8].mxu1 }
 0x114   :  { %v224_v29 = vadd.f32 %v223_v23, %v1715_v27  ;;  %v225_v30 = vpop.f32.mrb[9].mxu0  ;;  %v274_v31 = vadd.f32 %v273_v26, %v1715_v27  ;;  %v275_v32 = vpop.f32.mrb[9].mxu1 }
 0x115   :  { %v226_v33 = vadd.f32 %v225_v30, %v1719_v28  ;;  %v227_v34 = vpop.f32.mrb[10].mxu0  ;;  %652 = vmatprep.mubr.bf16.mxu1 %v383_v21  ;;  %v276_v35 = vadd.f32 %v275_v32, %v1719_v28  ;;  %v277_v36 = vpop.f32.mrb[10].mxu1 }
 0x116   :  { %v228_v37 = vadd.f32 %v227_v34, %v1715_v27  ;;  %v229_v38 = vpop.f32.mrb[11].mxu0  ;;  %653 = vmatmul.mubr.bf16.gmra.mrb[36].mxu1 %v382_v18  ;;  %v358_v39 = vmax.f32 %v274_v31, 0.0  ;;  %v278_v40 = vadd.f32 %v277_v36, %v1715_v27  ;;  %v279_v41 = vpop.f32.mrb[11].mxu1  ;;  %v338_v45 = vmax.f32 %v224_v29, 0.0 }
 0x117   :  { %v230_v42 = vadd.f32 %v229_v38, %v1719_v28  ;;  %v359_v43 = vmax.f32 %v276_v35, 0.0  ;;  %v280_v44 = vadd.f32 %v279_v41, %v1719_v28  ;;  %v339_v48 = vmax.f32 %v226_v33, 0.0 }
 0x118   :  { %v340_v46 = vmax.f32 %v228_v37, 0.0  ;;  %v360_v47 = vmax.f32 %v278_v40, 0.0 }
 0x119   :  { %v341_v49 = vmax.f32 %v230_v42, 0.0  ;;  %v361_v50 = vmax.f32 %v280_v44, 0.0 }
 0x11a   :  { %v384_v51 = vpack.c.bf16 %v340_v46, %v338_v45  ;;  %v1753_v52 = vpack.c.bf16 %v360_v47, %v358_v39 }
 0x11b   :  { %v385_v53 = vpack.c.bf16 %v341_v49, %v339_v48  ;;  %v233_v54 = vpop.f32.mrb[12].mxu0  ;;  %v1755_v56 = vpack.c.bf16 %v361_v50, %v359_v43  ;;  %v283_v57 = vpop.f32.mrb[12].mxu1 }
 0x11c   :  { %v234_v59 = vadd.f32 %v233_v54, %v1715_v27  ;;  %v235_v60 = vpop.f32.mrb[13].mxu0  ;;  %v284_v61 = vadd.f32 %v283_v57, %v1715_v27  ;;  %v285_v62 = vpop.f32.mrb[13].mxu1 }
 0x11d   :  { %v236_v63 = vadd.f32 %v235_v60, %v1719_v28  ;;  %v237_v1 = vpop.f32.mrb[14].mxu0  ;;  %662 = vmatprep.mubr.bf16.mxu1 %v385_v53  ;;  %v286_v2 = vadd.f32 %v285_v62, %v1719_v28  ;;  %v287_v3 = vpop.f32.mrb[14].mxu1 }
 0x11e   :  { %v238_v4 = vadd.f32 %v237_v1, %v1715_v27  ;;  %v239_v5 = vpop.f32.mrb[15].mxu0  ;;  %663 = vmatmul.mubr.bf16.gmra.mrb[40].mxu1 %v384_v51  ;;  %v362_v6 = vmax.f32 %v284_v61, 0.0  ;;  %v288_v0 = vadd.f32 %v287_v3, %v1715_v27  ;;  %v289_v7 = vpop.f32.mrb[15].mxu1  ;;  %v342_v11 = vmax.f32 %v234_v59, 0.0 }
 0x11f   :  { %v240_v8 = vadd.f32 %v239_v5, %v1719_v28  ;;  %v363_v9 = vmax.f32 %v286_v2, 0.0  ;;  %v290_v10 = vadd.f32 %v289_v7, %v1719_v28  ;;  %v343_v14 = vmax.f32 %v236_v63, 0.0 }
 0x120   :  { %v344_v12 = vmax.f32 %v238_v4, 0.0  ;;  %v364_v13 = vmax.f32 %v288_v0, 0.0 }
 0x121   :  { %v345_v15 = vmax.f32 %v240_v8, 0.0  ;;  %v365_v16 = vmax.f32 %v290_v10, 0.0 }
 0x122   :  { %v386_v17 = vpack.c.bf16 %v344_v12, %v342_v11  ;;  %v1765_v18 = vpack.c.bf16 %v364_v13, %v362_v6 }
 0x123   :  { %v387_v21 = vpack.c.bf16 %v345_v15, %v343_v14  ;;  %v243_v23 = vpop.f32.mrb[16].mxu0  ;;  %v1767_v26 = vpack.c.bf16 %v365_v16, %v363_v9  ;;  %v293_v29 = vpop.f32.mrb[16].mxu1 }
 0x124   :  { %v244_v30 = vadd.f32 %v243_v23, %v1715_v27  ;;  %v245_v31 = vpop.f32.mrb[17].mxu0  ;;  %v294_v32 = vadd.f32 %v293_v29, %v1715_v27  ;;  %v295_v33 = vpop.f32.mrb[17].mxu1 }
 0x125   :  { %v246_v34 = vadd.f32 %v245_v31, %v1719_v28  ;;  %v247_v35 = vpop.f32.mrb[18].mxu0  ;;  %672 = vmatprep.mubr.bf16.mxu1 %v387_v21  ;;  %v296_v36 = vadd.f32 %v295_v33, %v1719_v28  ;;  %v297_v37 = vpop.f32.mrb[18].mxu1 }
 0x126   :  { %v248_v38 = vadd.f32 %v247_v35, %v1715_v27  ;;  %v249_v39 = vpop.f32.mrb[19].mxu0  ;;  %673 = vmatmul.mubr.bf16.gmra.mrb[44].mxu1 %v386_v17  ;;  %v366_v40 = vmax.f32 %v294_v32, 0.0  ;;  %v298_v41 = vadd.f32 %v297_v37, %v1715_v27  ;;  %v299_v42 = vpop.f32.mrb[19].mxu1  ;;  %v346_v46 = vmax.f32 %v244_v30, 0.0  ;;  %v1387_v37 = vld [vmem:[#allocation4 + $0x30] sm:$0xff]  }
 0x127   :  { %v250_v43 = vadd.f32 %v249_v39, %v1719_v28  ;;  %v367_v44 = vmax.f32 %v296_v36, 0.0  ;;  %v300_v45 = vadd.f32 %v299_v42, %v1719_v28  ;;  %v347_v49 = vmax.f32 %v246_v34, 0.0 }
 0x128   :  { %v348_v47 = vmax.f32 %v248_v38, 0.0  ;;  %v368_v48 = vmax.f32 %v298_v41, 0.0 }
 0x129   :  { %v349_v50 = vmax.f32 %v250_v43, 0.0  ;;  %v369_v51 = vmax.f32 %v300_v45, 0.0 }
 0x12a   :  { %v388_v53 = vpack.c.bf16 %v348_v47, %v346_v46  ;;  %v398_v54 = vpack.c.bf16 %v368_v48, %v366_v40 }
 0x12b   :  { %v389_v57 = vpack.c.bf16 %v349_v50, %v347_v49  ;;  %v399_v59 = vpack.c.bf16 %v369_v51, %v367_v44  ;;  %v303_v60 = vpop.f32.mrb[20].mxu1 }
 0x12c   :  { %v304_v61 = vadd.f32 %v303_v60, %v1715_v27  ;;  %v305_v62 = vpop.f32.mrb[21].mxu1 }
 0x12d   :  { %682 = vmatprep.mubr.bf16.mxu1 %v389_v57  ;;  %v306_v63 = vadd.f32 %v305_v62, %v1719_v28  ;;  %v307_v1 = vpop.f32.mrb[22].mxu1 }
 0x12e   :  { %683 = vmatmul.mubr.bf16.gmra.mrb[48].mxu1 %v388_v53  ;;  %v370_v2 = vmax.f32 %v304_v61, 0.0  ;;  %v308_v3 = vadd.f32 %v307_v1, %v1715_v27  ;;  %v309_v4 = vpop.f32.mrb[23].mxu1 }
 0x12f   :  { %692 = vmatprep.mubr.bf16.mxu1 %v1731_v58  ;;  %v371_v5 = vmax.f32 %v306_v63, 0.0  ;;  %v310_v6 = vadd.f32 %v309_v4, %v1719_v28 }
 0x130   :  { %v372_v0 = vmax.f32 %v308_v3, 0.0 }
 0x131   :  { %v373_v7 = vmax.f32 %v310_v6, 0.0 }
 0x132   :  { %v400_v8 = vpack.c.bf16 %v372_v0, %v370_v2 }
 0x133   :  { %v401_v9 = vpack.c.bf16 %v373_v7, %v371_v5  ;;  %v313_v10 = vpop.f32.mrb[24].mxu1 }
 0x134   :  { %v314_v11 = vadd.f32 %v313_v10, %v1715_v27  ;;  %v315_v12 = vpop.f32.mrb[25].mxu1 }
 0x135   :  { %v316_v13 = vadd.f32 %v315_v12, %v1719_v28  ;;  %v317_v14 = vpop.f32.mrb[26].mxu1 }
 0x136   :  { %693 = vmatmul.mubr.bf16.gmra.mrb[52].mxu1 %v1729_v55  ;;  %v374_v15 = vmax.f32 %v314_v11, 0.0  ;;  %v318_v16 = vadd.f32 %v317_v14, %v1715_v27  ;;  %v319_v58 = vpop.f32.mrb[27].mxu1 }
 0x137   :  { %702 = vmatprep.mubr.bf16.mxu1 %v1743_v25  ;;  %v375_v17 = vmax.f32 %v316_v13, 0.0  ;;  %v320_v21 = vadd.f32 %v319_v58, %v1719_v28  ;;  %v1386_v25 = vld [vmem:[#allocation4 + $0x70] sm:$0xff]  }
 0x138   :  { %v376_v23 = vmax.f32 %v318_v16, 0.0  ;;  %1227 = vmatprep.subr.bf16.mxu0 %v1386_v25 }
 0x139   :  { %v377_v29 = vmax.f32 %v320_v21, 0.0  ;;  %1228 = vmatpush3.bf16.msra.mxu0 %v1387_v37 }
 0x13a   :  { %v402_v30 = vpack.c.bf16 %v376_v23, %v374_v15 }
 0x13b   :  { %v403_v31 = vpack.c.bf16 %v377_v29, %v375_v17  ;;  %v323_v32 = vpop.f32.mrb[28].mxu1 }
 0x13c   :  { %v324_v33 = vadd.f32 %v323_v32, %v1715_v27  ;;  %v325_v34 = vpop.f32.mrb[29].mxu1 }
 0x13d   :  { %v326_v35 = vadd.f32 %v325_v34, %v1719_v28  ;;  %v327_v55 = vpop.f32.mrb[30].mxu1 }
 0x13e   :  { %703 = vmatmul.mubr.bf16.gmra.mrb[56].mxu1 %v1741_v20  ;;  %v328_v36 = vpop.f32.mrb[31].mxu1  ;;  %v378_v20 = vmax.f32 %v324_v33, 0.0 }
 0x13f   :  { %712 = vmatprep.mubr.bf16.mxu1 %v1755_v56  ;;  %v379_v27 = vmax.f32 %v326_v35, 0.0  ;;  %v1388_v56 = vld [vmem:[#allocation4 + $0x78] sm:$0xff]  }
 0x140   :  { %1229 = vmatprep.subr.bf16.mxu0 %v1388_v56 }
 0x141   :  { %v405_v28 = vpack.c.bf16 %v379_v27, %v379_v27 }
 0x146   :  { %713 = vmatmul.mubr.bf16.gmra.mrb[60].mxu1 %v1753_v52  ;;  %v1389_v52 = vld [vmem:[#allocation4 + $0x38] sm:$0xff]  }
 0x147   :  { %722 = vmatprep.mubr.bf16.mxu1 %v1767_v26  ;;  %1230 = vmatpush3.bf16.msra.mxu0 %v1389_v52  ;;  %v404_v26 = vpack.c.bf16 %v378_v20, %v378_v20 }
 0x14e   :  { %723 = vmatmul.mubr.bf16.gmra.mrb[64].mxu1 %v1765_v18  ;;  %v438_v18 = vld [vmem:[%s1965_s4] sm:$0x3] }
 0x14f   :  { %732 = vmatprep.mubr.bf16.mxu1 %v399_v59  ;;  %v1800_v38 = vrot.slane %v438_v18, %v101_v22  ;;  %v1804_v39 = vrot.slane %v438_v18, %v105_v24 }
 0x156   :  { %733 = vmatmul.mubr.bf16.gmra.mrb[68].mxu1 %v398_v54 }
 0x157   :  { %742 = vmatprep.mubr.bf16.mxu1 %v401_v9 }
 0x15e   :  { %743 = vmatmul.mubr.bf16.gmra.mrb[72].mxu1 %v400_v8 }
 0x15f   :  { %752 = vmatprep.mubr.bf16.mxu1 %v403_v31 }
 0x166   :  { %753 = vmatmul.mubr.bf16.gmra.mrb[76].mxu1 %v402_v30 }
 0x167   :  { %762 = vmatprep.mubr.bf16.mxu1 %v405_v28 }
 0x16e   :  { %763 = vmatmul.mubr.bf16.gmra.mrb[80].mxu1 %v404_v26 }
 0x1e1   :  { %v644_v40 = vpop.f32.mrb[32].mxu1 }
 0x1e2   :  { %v645_v41 = vadd.f32 %v644_v40, %v1800_v38  ;;  %v646_v42 = vpop.f32.mrb[33].mxu1 }
 0x1e3   :  { %v647_v43 = vadd.f32 %v646_v42, %v1804_v39  ;;  %v648_v44 = vpop.f32.mrb[34].mxu1 }
 0x1e4   :  { %v649_v45 = vadd.f32 %v648_v44, %v1800_v38  ;;  %v650_v46 = vpop.f32.mrb[35].mxu1  ;;  %v771_v48 = vmax.f32 %v645_v41, 0.0 }
 0x1e5   :  { %v651_v47 = vadd.f32 %v650_v46, %v1804_v39  ;;  %v772_v22 = vmax.f32 %v647_v43, 0.0 }
 0x1e6   :  { %v773_v49 = vmax.f32 %v649_v45, 0.0 }
 0x1e7   :  { %v774_v50 = vmax.f32 %v651_v47, 0.0 }
 0x1e8   :  { %v821_v51 = vpack.c.bf16 %v773_v49, %v771_v48 }
 0x1e9   :  { %v822_v19 = vpack.c.bf16 %v774_v50, %v772_v22  ;;  %v654_v24 = vpop.f32.mrb[36].mxu1 }
 0x1ea   :  { %v655_v53 = vadd.f32 %v654_v24, %v1800_v38  ;;  %v656_v54 = vpop.f32.mrb[37].mxu1 }
 0x1eb   :  { %v657_v57 = vadd.f32 %v656_v54, %v1804_v39  ;;  %v658_v59 = vpop.f32.mrb[38].mxu1  ;;  %1014 = vmatprep.mubr.bf16.mxu0 %v822_v19 }
 0x1ec   :  { %v659_v60 = vadd.f32 %v658_v59, %v1800_v38  ;;  %v660_v61 = vpop.f32.mrb[39].mxu1  ;;  %1015 = vmatmul.mubr.bf16.vlgmr.msra.gmra.mrb[20].mxu0 %v821_v51  ;;  %v775_v63 = vmax.f32 %v655_v53, 0.0 }
 0x1ed   :  { %v661_v62 = vadd.f32 %v660_v61, %v1804_v39  ;;  %v776_v2 = vmax.f32 %v657_v57, 0.0 }
 0x1ee   :  { %v777_v1 = vmax.f32 %v659_v60, 0.0 }
 0x1ef   :  { %v778_v3 = vmax.f32 %v661_v62, 0.0 }
 0x1f0   :  { %v823_v4 = vpack.c.bf16 %v777_v1, %v775_v63 }
 0x1f1   :  { %v824_v5 = vpack.c.bf16 %v778_v3, %v776_v2  ;;  %v664_v6 = vpop.f32.mrb[40].mxu1 }
 0x1f2   :  { %v665_v0 = vadd.f32 %v664_v6, %v1800_v38  ;;  %v666_v7 = vpop.f32.mrb[41].mxu1 }
 0x1f3   :  { %v667_v8 = vadd.f32 %v666_v7, %v1804_v39  ;;  %v668_v9 = vpop.f32.mrb[42].mxu1  ;;  %1022 = vmatprep.mubr.bf16.mxu0 %v824_v5 }
 0x1f4   :  { %v669_v10 = vadd.f32 %v668_v9, %v1800_v38  ;;  %v670_v11 = vpop.f32.mrb[43].mxu1  ;;  %1023 = vmatmul.mubr.bf16.gmra.mrb[24].mxu0 %v823_v4  ;;  %v779_v13 = vmax.f32 %v665_v0, 0.0 }
 0x1f5   :  { %v671_v12 = vadd.f32 %v670_v11, %v1804_v39  ;;  %v780_v15 = vmax.f32 %v667_v8, 0.0 }
 0x1f6   :  { %v781_v14 = vmax.f32 %v669_v10, 0.0 }
 0x1f7   :  { %v782_v16 = vmax.f32 %v671_v12, 0.0 }
 0x1f8   :  { %v825_v58 = vpack.c.bf16 %v781_v14, %v779_v13 }
 0x1f9   :  { %v826_v17 = vpack.c.bf16 %v782_v16, %v780_v15  ;;  %v674_v21 = vpop.f32.mrb[44].mxu1 }
 0x1fa   :  { %v675_v23 = vadd.f32 %v674_v21, %v1800_v38  ;;  %v676_v29 = vpop.f32.mrb[45].mxu1 }
 0x1fb   :  { %v677_v30 = vadd.f32 %v676_v29, %v1804_v39  ;;  %v678_v31 = vpop.f32.mrb[46].mxu1  ;;  %1030 = vmatprep.mubr.bf16.mxu0 %v826_v17 }
 0x1fc   :  { %v679_v32 = vadd.f32 %v678_v31, %v1800_v38  ;;  %v680_v33 = vpop.f32.mrb[47].mxu1  ;;  %1031 = vmatmul.mubr.bf16.gmra.mrb[28].mxu0 %v825_v58  ;;  %v783_v35 = vmax.f32 %v675_v23, 0.0 }
 0x1fd   :  { %v681_v34 = vadd.f32 %v680_v33, %v1804_v39  ;;  %v784_v36 = vmax.f32 %v677_v30, 0.0 }
 0x1fe   :  { %v785_v55 = vmax.f32 %v679_v32, 0.0 }
 0x1ff   :  { %v786_v27 = vmax.f32 %v681_v34, 0.0 }
 0x200   :  { %v827_v25 = vpack.c.bf16 %v785_v55, %v783_v35 }
 0x201   :  { %v828_v28 = vpack.c.bf16 %v786_v27, %v784_v36  ;;  %v684_v37 = vpop.f32.mrb[48].mxu1 }
 0x202   :  { %v685_v20 = vadd.f32 %v684_v37, %v1800_v38  ;;  %v686_v56 = vpop.f32.mrb[49].mxu1 }
 0x203   :  { %v687_v52 = vadd.f32 %v686_v56, %v1804_v39  ;;  %v688_v26 = vpop.f32.mrb[50].mxu1  ;;  %1038 = vmatprep.mubr.bf16.mxu0 %v828_v28 }
 0x204   :  { %v689_v18 = vadd.f32 %v688_v26, %v1800_v38  ;;  %v690_v40 = vpop.f32.mrb[51].mxu1  ;;  %1039 = vmatmul.mubr.bf16.gmra.mrb[32].mxu0 %v827_v25  ;;  %v787_v42 = vmax.f32 %v685_v20, 0.0 }
 0x205   :  { %v691_v41 = vadd.f32 %v690_v40, %v1804_v39  ;;  %v788_v44 = vmax.f32 %v687_v52, 0.0 }
 0x206   :  { %v789_v43 = vmax.f32 %v689_v18, 0.0 }
 0x207   :  { %v790_v45 = vmax.f32 %v691_v41, 0.0 }
 0x208   :  { %v829_v46 = vpack.c.bf16 %v789_v43, %v787_v42 }
 0x209   :  { %v830_v47 = vpack.c.bf16 %v790_v45, %v788_v44  ;;  %v694_v48 = vpop.f32.mrb[52].mxu1 }
 0x20a   :  { %v695_v49 = vadd.f32 %v694_v48, %v1800_v38  ;;  %v696_v22 = vpop.f32.mrb[53].mxu1 }
 0x20b   :  { %v697_v50 = vadd.f32 %v696_v22, %v1804_v39  ;;  %v698_v51 = vpop.f32.mrb[54].mxu1  ;;  %1046 = vmatprep.mubr.bf16.mxu0 %v830_v47 }
 0x20c   :  { %v699_v19 = vadd.f32 %v698_v51, %v1800_v38  ;;  %v700_v24 = vpop.f32.mrb[55].mxu1  ;;  %1047 = vmatmul.mubr.bf16.gmra.mrb[36].mxu0 %v829_v46  ;;  %v791_v54 = vmax.f32 %v695_v49, 0.0 }
 0x20d   :  { %v701_v53 = vadd.f32 %v700_v24, %v1804_v39  ;;  %v792_v59 = vmax.f32 %v697_v50, 0.0 }
 0x20e   :  { %v793_v57 = vmax.f32 %v699_v19, 0.0 }
 0x20f   :  { %v794_v60 = vmax.f32 %v701_v53, 0.0 }
 0x210   :  { %v831_v61 = vpack.c.bf16 %v793_v57, %v791_v54 }
 0x211   :  { %v832_v62 = vpack.c.bf16 %v794_v60, %v792_v59  ;;  %v704_v63 = vpop.f32.mrb[56].mxu1 }
 0x212   :  { %v705_v1 = vadd.f32 %v704_v63, %v1800_v38  ;;  %v706_v2 = vpop.f32.mrb[57].mxu1 }
 0x213   :  { %v707_v3 = vadd.f32 %v706_v2, %v1804_v39  ;;  %v708_v4 = vpop.f32.mrb[58].mxu1  ;;  %1054 = vmatprep.mubr.bf16.mxu0 %v832_v62 }
 0x214   :  { %v709_v5 = vadd.f32 %v708_v4, %v1800_v38  ;;  %v710_v6 = vpop.f32.mrb[59].mxu1  ;;  %1055 = vmatmul.mubr.bf16.gmra.mrb[40].mxu0 %v831_v61  ;;  %v795_v7 = vmax.f32 %v705_v1, 0.0 }
 0x215   :  { %v711_v0 = vadd.f32 %v710_v6, %v1804_v39  ;;  %v796_v9 = vmax.f32 %v707_v3, 0.0 }
 0x216   :  { %v797_v8 = vmax.f32 %v709_v5, 0.0 }
 0x217   :  { %v798_v10 = vmax.f32 %v711_v0, 0.0 }
 0x218   :  { %v833_v11 = vpack.c.bf16 %v797_v8, %v795_v7 }
 0x219   :  { %v834_v12 = vpack.c.bf16 %v798_v10, %v796_v9  ;;  %v714_v13 = vpop.f32.mrb[60].mxu1 }
 0x21a   :  { %v715_v14 = vadd.f32 %v714_v13, %v1800_v38  ;;  %v716_v15 = vpop.f32.mrb[61].mxu1 }
 0x21b   :  { %v717_v16 = vadd.f32 %v716_v15, %v1804_v39  ;;  %v718_v58 = vpop.f32.mrb[62].mxu1  ;;  %1062 = vmatprep.mubr.bf16.mxu0 %v834_v12 }
 0x21c   :  { %v719_v17 = vadd.f32 %v718_v58, %v1800_v38  ;;  %v720_v21 = vpop.f32.mrb[63].mxu1  ;;  %1063 = vmatmul.mubr.bf16.gmra.mrb[44].mxu0 %v833_v11  ;;  %v799_v29 = vmax.f32 %v715_v14, 0.0 }
 0x21d   :  { %v721_v23 = vadd.f32 %v720_v21, %v1804_v39  ;;  %v800_v31 = vmax.f32 %v717_v16, 0.0 }
 0x21e   :  { %v801_v30 = vmax.f32 %v719_v17, 0.0 }
 0x21f   :  { %v802_v32 = vmax.f32 %v721_v23, 0.0 }
 0x220   :  { %v835_v33 = vpack.c.bf16 %v801_v30, %v799_v29 }
 0x221   :  { %v836_v34 = vpack.c.bf16 %v802_v32, %v800_v31  ;;  %v724_v35 = vpop.f32.mrb[64].mxu1 }
 0x222   :  { %v725_v55 = vadd.f32 %v724_v35, %v1800_v38  ;;  %v726_v36 = vpop.f32.mrb[65].mxu1 }
 0x223   :  { %v727_v27 = vadd.f32 %v726_v36, %v1804_v39  ;;  %v728_v25 = vpop.f32.mrb[66].mxu1  ;;  %1070 = vmatprep.mubr.bf16.mxu0 %v836_v34 }
 0x224   :  { %v729_v28 = vadd.f32 %v728_v25, %v1800_v38  ;;  %v730_v37 = vpop.f32.mrb[67].mxu1  ;;  %1071 = vmatmul.mubr.bf16.gmra.mrb[48].mxu0 %v835_v33  ;;  %v803_v56 = vmax.f32 %v725_v55, 0.0 }
 0x225   :  { %v731_v20 = vadd.f32 %v730_v37, %v1804_v39  ;;  %v804_v26 = vmax.f32 %v727_v27, 0.0 }
 0x226   :  { %v805_v52 = vmax.f32 %v729_v28, 0.0  ;;  %v1859_v28 = vld [vmem:[%s1967_s6] ss:$0 sm:$0xff] }
 0x227   :  { %v806_v18 = vmax.f32 %v731_v20, 0.0 }
 0x228   :  { %v837_v40 = vpack.c.bf16 %v805_v52, %v803_v56 }
 0x229   :  { %v838_v41 = vpack.c.bf16 %v806_v18, %v804_v26  ;;  %v734_v42 = vpop.f32.mrb[68].mxu1 }
 0x22a   :  { %v735_v43 = vadd.f32 %v734_v42, %v1800_v38  ;;  %v736_v44 = vpop.f32.mrb[69].mxu1 }
 0x22b   :  { %v737_v45 = vadd.f32 %v736_v44, %v1804_v39  ;;  %v738_v46 = vpop.f32.mrb[70].mxu1  ;;  %1078 = vmatprep.mubr.bf16.mxu0 %v838_v41 }
 0x22c   :  { %v739_v47 = vadd.f32 %v738_v46, %v1800_v38  ;;  %v740_v48 = vpop.f32.mrb[71].mxu1  ;;  %1079 = vmatmul.mubr.bf16.gmra.mrb[52].mxu0 %v837_v40  ;;  %v807_v22 = vmax.f32 %v735_v43, 0.0 }
 0x22d   :  { %v741_v49 = vadd.f32 %v740_v48, %v1804_v39  ;;  %v808_v51 = vmax.f32 %v737_v45, 0.0 }
 0x22e   :  { %v809_v50 = vmax.f32 %v739_v47, 0.0 }
 0x22f   :  { %v810_v19 = vmax.f32 %v741_v49, 0.0 }
 0x230   :  { %v839_v24 = vpack.c.bf16 %v809_v50, %v807_v22 }
 0x231   :  { %v840_v53 = vpack.c.bf16 %v810_v19, %v808_v51  ;;  %v744_v54 = vpop.f32.mrb[72].mxu1 }
 0x232   :  { %v745_v57 = vadd.f32 %v744_v54, %v1800_v38  ;;  %v746_v59 = vpop.f32.mrb[73].mxu1 }
 0x233   :  { %v747_v60 = vadd.f32 %v746_v59, %v1804_v39  ;;  %v748_v61 = vpop.f32.mrb[74].mxu1  ;;  %1086 = vmatprep.mubr.bf16.mxu0 %v840_v53 }
 0x234   :  { %v749_v62 = vadd.f32 %v748_v61, %v1800_v38  ;;  %v750_v63 = vpop.f32.mrb[75].mxu1  ;;  %1087 = vmatmul.mubr.bf16.gmra.mrb[56].mxu0 %v839_v24  ;;  %v811_v2 = vmax.f32 %v745_v57, 0.0 }
 0x235   :  { %v751_v1 = vadd.f32 %v750_v63, %v1804_v39  ;;  %v812_v4 = vmax.f32 %v747_v60, 0.0 }
 0x236   :  { %v813_v3 = vmax.f32 %v749_v62, 0.0 }
 0x237   :  { %v814_v5 = vmax.f32 %v751_v1, 0.0 }
 0x238   :  { %v841_v6 = vpack.c.bf16 %v813_v3, %v811_v2 }
 0x239   :  { %v842_v0 = vpack.c.bf16 %v814_v5, %v812_v4  ;;  %v754_v7 = vpop.f32.mrb[76].mxu1 }
 0x23a   :  { %v755_v8 = vadd.f32 %v754_v7, %v1800_v38  ;;  %v756_v9 = vpop.f32.mrb[77].mxu1 }
 0x23b   :  { %v757_v10 = vadd.f32 %v756_v9, %v1804_v39  ;;  %v758_v11 = vpop.f32.mrb[78].mxu1  ;;  %1094 = vmatprep.mubr.bf16.mxu0 %v842_v0 }
 0x23c   :  { %v759_v12 = vadd.f32 %v758_v11, %v1800_v38  ;;  %v760_v13 = vpop.f32.mrb[79].mxu1  ;;  %1095 = vmatmul.mubr.bf16.gmra.mrb[60].mxu0 %v841_v6  ;;  %v815_v15 = vmax.f32 %v755_v8, 0.0 }
 0x23d   :  { %v761_v14 = vadd.f32 %v760_v13, %v1804_v39  ;;  %v816_v58 = vmax.f32 %v757_v10, 0.0 }
 0x23e   :  { %v817_v16 = vmax.f32 %v759_v12, 0.0 }
 0x23f   :  { %v818_v17 = vmax.f32 %v761_v14, 0.0 }
 0x240   :  { %v843_v21 = vpack.c.bf16 %v817_v16, %v815_v15 }
 0x241   :  { %v844_v23 = vpack.c.bf16 %v818_v17, %v816_v58  ;;  %v764_v29 = vpop.f32.mrb[80].mxu1 }
 0x242   :  { %v765_v30 = vadd.f32 %v764_v29, %v1800_v38  ;;  %v766_v31 = vpop.f32.mrb[81].mxu1 }
 0x243   :  { %v767_v32 = vadd.f32 %v766_v31, %v1804_v39  ;;  %v768_v33 = vpop.f32.mrb[82].mxu1  ;;  %1102 = vmatprep.mubr.bf16.mxu0 %v844_v23 }
 0x244   :  { %v769_v34 = vpop.f32.mrb[83].mxu1  ;;  %1103 = vmatmul.mubr.bf16.gmra.mrb[64].mxu0 %v843_v21  ;;  %v819_v55 = vmax.f32 %v765_v30, 0.0 }
 0x245   :  { %v820_v35 = vmax.f32 %v767_v32, 0.0 }
 0x246   :  { %v845_v27 = vpack.c.bf16 %v819_v55, %v819_v55 }
 0x247   :  { %v846_v36 = vpack.c.bf16 %v820_v35, %v820_v35 }
 0x249   :  { %1110 = vmatprep.mubr.bf16.mxu0 %v846_v36 }
 0x24c   :  { %1111 = vmatmul.mubr.bf16.gmra.mrb[68].mxu0 %v845_v27 }
 0x2bf   :  { %v1231_v25 = vpop.f32.mrb[20].mxu0 }
 0x2c0   :  { %v1232_v38 = vpop.f32.mrb[21].mxu0 }
 0x2c1   :  { %v1233_v37 = vadd.f32 %v1232_v38, %v1231_v25  ;;  %v1234_v20 = vpop.f32.mrb[22].mxu0 }
 0x2c2   :  { %v1235_v39 = vpop.f32.mrb[23].mxu0 }
 0x2c3   :  { %v1017_v56 = vadd.f32 %v1233_v37, %v1859_v28  ;;  %v1236_v52 = vadd.f32 %v1235_v39, %v1234_v20 }
 0x2c5   :  { %1118 = vst [vmem:[%s1968_s7] sm:$0xff] %v1017_v56  ;;  %v1020_v26 = vadd.f32 %v1236_v52, %v1859_v28 }
 0x2c7   :  { %1119 = vst [vmem:[%s1968_s7 + $0x8] sm:$0xff] %v1020_v26  ;;  %v1237_v18 = vpop.f32.mrb[24].mxu0 }
 0x2c8   :  { %v1238_v40 = vpop.f32.mrb[25].mxu0 }
 0x2c9   :  { %v1239_v41 = vadd.f32 %v1238_v40, %v1237_v18  ;;  %v1240_v42 = vpop.f32.mrb[26].mxu0 }
 0x2ca   :  { %v1241_v43 = vpop.f32.mrb[27].mxu0 }
 0x2cb   :  { %v1025_v44 = vadd.f32 %v1239_v41, %v1859_v28  ;;  %v1242_v45 = vadd.f32 %v1241_v43, %v1240_v42 }
 0x2cd   :  { %1120 = vst [vmem:[%s1968_s7 + $0x10] sm:$0xff] %v1025_v44  ;;  %v1028_v46 = vadd.f32 %v1242_v45, %v1859_v28 }
 0x2cf   :  { %1121 = vst [vmem:[%s1968_s7 + $0x18] sm:$0xff] %v1028_v46  ;;  %v1243_v47 = vpop.f32.mrb[28].mxu0 }
 0x2d0   :  { %v1244_v48 = vpop.f32.mrb[29].mxu0 }
 0x2d1   :  { %v1245_v49 = vadd.f32 %v1244_v48, %v1243_v47  ;;  %v1246_v22 = vpop.f32.mrb[30].mxu0 }
 0x2d2   :  { %v1247_v50 = vpop.f32.mrb[31].mxu0 }
 0x2d3   :  { %v1033_v51 = vadd.f32 %v1245_v49, %v1859_v28  ;;  %v1248_v19 = vadd.f32 %v1247_v50, %v1246_v22 }
 0x2d5   :  { %1122 = vst [vmem:[%s1968_s7 + $0x20] sm:$0xff] %v1033_v51  ;;  %v1036_v24 = vadd.f32 %v1248_v19, %v1859_v28 }
 0x2d7   :  { %1123 = vst [vmem:[%s1968_s7 + $0x28] sm:$0xff] %v1036_v24  ;;  %v1249_v53 = vpop.f32.mrb[32].mxu0 }
 0x2d8   :  { %v1250_v54 = vpop.f32.mrb[33].mxu0 }
 0x2d9   :  { %v1251_v57 = vadd.f32 %v1250_v54, %v1249_v53  ;;  %v1252_v59 = vpop.f32.mrb[34].mxu0 }
 0x2da   :  { %v1253_v60 = vpop.f32.mrb[35].mxu0 }
 0x2db   :  { %v1041_v61 = vadd.f32 %v1251_v57, %v1859_v28  ;;  %v1254_v62 = vadd.f32 %v1253_v60, %v1252_v59 }
 0x2dd   :  { %1124 = vst [vmem:[%s1968_s7 + $0x30] sm:$0xff] %v1041_v61  ;;  %v1044_v63 = vadd.f32 %v1254_v62, %v1859_v28 }
 0x2df   :  { %1125 = vst [vmem:[%s1968_s7 + $0x38] sm:$0xff] %v1044_v63  ;;  %v1255_v1 = vpop.f32.mrb[36].mxu0 }
 0x2e0   :  { %v1256_v2 = vpop.f32.mrb[37].mxu0 }
 0x2e1   :  { %v1257_v3 = vadd.f32 %v1256_v2, %v1255_v1  ;;  %v1258_v4 = vpop.f32.mrb[38].mxu0 }
 0x2e2   :  { %v1259_v5 = vpop.f32.mrb[39].mxu0 }
 0x2e3   :  { %v1049_v6 = vadd.f32 %v1257_v3, %v1859_v28  ;;  %v1260_v0 = vadd.f32 %v1259_v5, %v1258_v4 }
 0x2e5   :  { %1126 = vst [vmem:[%s1968_s7 + $0x40] sm:$0xff] %v1049_v6  ;;  %v1052_v7 = vadd.f32 %v1260_v0, %v1859_v28 }
 0x2e7   :  { %1127 = vst [vmem:[%s1968_s7 + $0x48] sm:$0xff] %v1052_v7  ;;  %v1261_v8 = vpop.f32.mrb[40].mxu0 }
 0x2e8   :  { %v1262_v9 = vpop.f32.mrb[41].mxu0 }
 0x2e9   :  { %v1263_v10 = vadd.f32 %v1262_v9, %v1261_v8  ;;  %v1264_v11 = vpop.f32.mrb[42].mxu0 }
 0x2ea   :  { %v1265_v12 = vpop.f32.mrb[43].mxu0 }
 0x2eb   :  { %v1057_v13 = vadd.f32 %v1263_v10, %v1859_v28  ;;  %v1266_v14 = vadd.f32 %v1265_v12, %v1264_v11 }
 0x2ed   :  { %1128 = vst [vmem:[%s1968_s7 + $0x50] sm:$0xff] %v1057_v13  ;;  %v1060_v15 = vadd.f32 %v1266_v14, %v1859_v28 }
 0x2ef   :  { %1129 = vst [vmem:[%s1968_s7 + $0x58] sm:$0xff] %v1060_v15  ;;  %v1267_v16 = vpop.f32.mrb[44].mxu0 }
 0x2f0   :  { %v1268_v58 = vpop.f32.mrb[45].mxu0 }
 0x2f1   :  { %v1269_v17 = vadd.f32 %v1268_v58, %v1267_v16  ;;  %v1270_v21 = vpop.f32.mrb[46].mxu0 }
 0x2f2   :  { %v1271_v23 = vpop.f32.mrb[47].mxu0 }
 0x2f3   :  { %v1065_v29 = vadd.f32 %v1269_v17, %v1859_v28  ;;  %v1272_v30 = vadd.f32 %v1271_v23, %v1270_v21 }
 0x2f5   :  { %1130 = vst [vmem:[%s1968_s7 + $0x60] sm:$0xff] %v1065_v29  ;;  %v1068_v31 = vadd.f32 %v1272_v30, %v1859_v28 }
 0x2f7   :  { %1131 = vst [vmem:[%s1968_s7 + $0x68] sm:$0xff] %v1068_v31  ;;  %v1273_v32 = vpop.f32.mrb[48].mxu0 }
 0x2f8   :  { %v1274_v33 = vpop.f32.mrb[49].mxu0 }
 0x2f9   :  { %v1275_v34 = vadd.f32 %v1274_v33, %v1273_v32  ;;  %v1276_v35 = vpop.f32.mrb[50].mxu0 }
 0x2fa   :  { %v1277_v55 = vpop.f32.mrb[51].mxu0 }
 0x2fb   :  { %v1073_v36 = vadd.f32 %v1275_v34, %v1859_v28  ;;  %v1278_v27 = vadd.f32 %v1277_v55, %v1276_v35 }
 0x2fd   :  { %1132 = vst [vmem:[%s1968_s7 + $0x70] sm:$0xff] %v1073_v36  ;;  %v1076_v25 = vadd.f32 %v1278_v27, %v1859_v28 }
 0x2ff   :  { %1133 = vst [vmem:[%s1968_s7 + $0x78] sm:$0xff] %v1076_v25  ;;  %v1279_v38 = vpop.f32.mrb[52].mxu0 }
 0x300   :  { %v1280_v37 = vpop.f32.mrb[53].mxu0 }
 0x301   :  { %v1281_v20 = vadd.f32 %v1280_v37, %v1279_v38  ;;  %v1282_v39 = vpop.f32.mrb[54].mxu0 }
 0x302   :  { %v1283_v56 = vpop.f32.mrb[55].mxu0 }
 0x303   :  { %v1081_v52 = vadd.f32 %v1281_v20, %v1859_v28  ;;  %v1284_v26 = vadd.f32 %v1283_v56, %v1282_v39 }
 0x305   :  { %1134 = vst [vmem:[%s1968_s7 + $0x80] sm:$0xff] %v1081_v52  ;;  %v1084_v18 = vadd.f32 %v1284_v26, %v1859_v28 }
 0x307   :  { %1135 = vst [vmem:[%s1968_s7 + $0x88] sm:$0xff] %v1084_v18  ;;  %v1285_v40 = vpop.f32.mrb[56].mxu0 }
 0x308   :  { %v1286_v41 = vpop.f32.mrb[57].mxu0 }
 0x309   :  { %v1287_v42 = vadd.f32 %v1286_v41, %v1285_v40  ;;  %v1288_v43 = vpop.f32.mrb[58].mxu0 }
 0x30a   :  { %v1289_v44 = vpop.f32.mrb[59].mxu0 }
 0x30b   :  { %v1089_v45 = vadd.f32 %v1287_v42, %v1859_v28  ;;  %v1290_v46 = vadd.f32 %v1289_v44, %v1288_v43 }
 0x30d   :  { %1136 = vst [vmem:[%s1968_s7 + $0x90] sm:$0xff] %v1089_v45  ;;  %v1092_v47 = vadd.f32 %v1290_v46, %v1859_v28 }
 0x30f   :  { %1137 = vst [vmem:[%s1968_s7 + $0x98] sm:$0xff] %v1092_v47  ;;  %v1291_v48 = vpop.f32.mrb[60].mxu0 }
 0x310   :  { %v1292_v49 = vpop.f32.mrb[61].mxu0 }
 0x311   :  { %v1293_v22 = vadd.f32 %v1292_v49, %v1291_v48  ;;  %v1294_v50 = vpop.f32.mrb[62].mxu0 }
 0x312   :  { %v1295_v51 = vpop.f32.mrb[63].mxu0 }
 0x313   :  { %v1097_v19 = vadd.f32 %v1293_v22, %v1859_v28  ;;  %v1296_v24 = vadd.f32 %v1295_v51, %v1294_v50 }
 0x315   :  { %1138 = vst [vmem:[%s1968_s7 + $0xa0] sm:$0xff] %v1097_v19  ;;  %v1100_v53 = vadd.f32 %v1296_v24, %v1859_v28 }
 0x317   :  { %1139 = vst [vmem:[%s1968_s7 + $0xa8] sm:$0xff] %v1100_v53  ;;  %v1297_v54 = vpop.f32.mrb[64].mxu0 }
 0x318   :  { %v1298_v57 = vpop.f32.mrb[65].mxu0 }
 0x319   :  { %v1299_v59 = vadd.f32 %v1298_v57, %v1297_v54  ;;  %v1300_v60 = vpop.f32.mrb[66].mxu0 }
 0x31a   :  { %v1301_v61 = vpop.f32.mrb[67].mxu0 }
 0x31b   :  { %v1105_v62 = vadd.f32 %v1299_v59, %v1859_v28  ;;  %v1302_v63 = vadd.f32 %v1301_v61, %v1300_v60 }
 0x31d   :  { %1140 = vst [vmem:[%s1968_s7 + $0xb0] sm:$0xff] %v1105_v62  ;;  %v1108_v1 = vadd.f32 %v1302_v63, %v1859_v28 }
 0x31f   :  { %1141 = vst [vmem:[%s1968_s7 + $0xb8] sm:$0xff] %v1108_v1  ;;  %v1303_v2 = vpop.f32.mrb[68].mxu0 }
 0x320   :  { %v1304_v3 = vpop.f32.mrb[69].mxu0 }
 0x321   :  { %v1305_v4 = vadd.f32 %v1304_v3, %v1303_v2  ;;  %v1306_v5 = vpop.f32.mrb[70].mxu0 }
 0x322   :  { %v1307_v6 = vpop.f32.mrb[71].mxu0 }
 0x323   :  { %v1113_v0 = vadd.f32 %v1305_v4, %v1859_v28 }
 0x325   :  { %1142 = vst [vmem:[%s1968_s7 + $0xc0] sm:$0xff] %v1113_v0 }
 0x326   :  { %1147 = vsyncpa [#allocation3], 1 }
 0x327   :  { %1148 = vsyncpa [#allocation5], 1 }

</bundles_post_ra>
